<compile_context>
chip_gen: v5e
topology: v5e:2x2
jax: 0.10.0
libtpu: 0.0.40
codegen_flags: <defaults>
</compile_context>

<pallas_src>
import functools

import jax
import jax.numpy as jnp
from jax import lax
from jax.experimental import pallas as pl
from jax.experimental.pallas import tpu as pltpu


# ------------------------------ small helpers -------------------------------


def _pick_tile(dim, target, align):
    """Largest tile <= target that divides dim and is a multiple of align.
    Falls back to the full dimension (always a legal block size)."""
    if dim <= target:
        return dim
    t = (target // align) * align
    while t >= align:
        if dim % t == 0:
            return t
        t -= align
    return dim


def _compiler_params(sem):
    # Explicit scoped-VMEM budget (default is only 16/32 MiB on v5e/v6e-v7x);
    # 48 MiB leaves headroom under v7x's 64 MiB physical VMEM.
    return pltpu.CompilerParams(dimension_semantics=sem,
                                vmem_limit_bytes=48 * 1024 * 1024)


# ------------------------------ Pallas kernels ------------------------------


def _dense_kernel(x_ref, w_ref, b_ref, o_ref, acc_ref, *, activation):
    """Tiled y = x @ w + b (+ optional GELU). bf16 MXU inputs, f32 accumulate."""
    @pl.when(pl.program_id(2) == 0)
    def _init():
        acc_ref[...] = jnp.zeros_like(acc_ref)

    acc_ref[...] += jnp.dot(x_ref[...], w_ref[...],
                            preferred_element_type=jnp.float32)

    @pl.when(pl.program_id(2) == pl.num_programs(2) - 1)
    def _finalize():
        y = acc_ref[...] + b_ref[...]
        if activation == "gelu":
            # TODO(synk): PyTorch nn.GELU default is the exact erf form; the
            # tanh approximation is used here (tiny numeric difference).
            y = jax.nn.gelu(y, approximate=True)
        o_ref[...] = y.astype(o_ref.dtype)


def dense(x, w, b, activation=None, out_dtype=jnp.bfloat16,
          tm=512, tn=1024, tk=None):
    """x:(M,K) bf16, w:(K,N) bf16, b:(1,N) f32 -> (M,N) out_dtype."""
    M, K = x.shape
    N = w.shape[1]
    tm = _pick_tile(M, tm, 16)          # bf16 packs two rows per sublane
    tn = _pick_tile(N, tn, 128)
    if tk is None:
        tk = K if K <= 4096 else 2048   # single K step: no K-axis weight re-fetch
    tk = _pick_tile(K, tk, 128)
    grid = (N // tn, M // tm, K // tk)
    return pl.pallas_call(
        functools.partial(_dense_kernel, activation=activation),
        grid=grid,
        in_specs=[
            pl.BlockSpec((tm, tk), lambda j, i, k: (i, k)),
            pl.BlockSpec((tk, tn), lambda j, i, k: (k, j)),   # const across i
            pl.BlockSpec((1, tn), lambda j, i, k: (0, j)),
        ],
        out_specs=pl.BlockSpec((tm, tn), lambda j, i, k: (i, j)),
        out_shape=jax.ShapeDtypeStruct((M, N), out_dtype),
        scratch_shapes=[pltpu.VMEM((tm, tn), jnp.float32)],
        compiler_params=_compiler_params(("parallel", "parallel", "arbitrary")),
    )(x, w, b)


def _dense_add_ln_kernel(x_ref, w_ref, b_ref, r_ref, g_ref, bb_ref,
                         o_ref, acc_ref, *, eps):
    """Fused: (x @ w + b + residual) -> LayerNorm. Output N is untiled (full H)."""
    @pl.when(pl.program_id(1) == 0)
    def _init():
        acc_ref[...] = jnp.zeros_like(acc_ref)

    acc_ref[...] += jnp.dot(x_ref[...], w_ref[...],
                            preferred_element_type=jnp.float32)

    @pl.when(pl.program_id(1) == pl.num_programs(1) - 1)
    def _finalize():
        y = acc_ref[...] + b_ref[...] + r_ref[...].astype(jnp.float32)
        mu = jnp.mean(y, axis=-1, keepdims=True)
        var = jnp.mean((y - mu) * (y - mu), axis=-1, keepdims=True)
        inv = lax.rsqrt(var + eps)
        o_ref[...] = ((y - mu) * inv * g_ref[...] + bb_ref[...]).astype(o_ref.dtype)


def dense_add_layernorm(x, w, b, residual, gamma, beta, eps=1e-12,
                        tm=512, tk=None):
    """x:(M,K) bf16, w:(K,N) bf16, residual:(M,N) bf16 -> (M,N) bf16."""
    M, K = x.shape
    N = w.shape[1]
    tm = _pick_tile(M, tm, 16)
    if tk is None:
        tk = K if K <= 4096 else 2048   # weight resident across the M sweep
    tk = _pick_tile(K, tk, 128)
    grid = (M // tm, K // tk)
    return pl.pallas_call(
        functools.partial(_dense_add_ln_kernel, eps=eps),
        grid=grid,
        in_specs=[
            pl.BlockSpec((tm, tk), lambda i, k: (i, k)),
            pl.BlockSpec((tk, N), lambda i, k: (k, 0)),        # const across i
            pl.BlockSpec((1, N), lambda i, k: (0, 0)),
            pl.BlockSpec((tm, N), lambda i, k: (i, 0)),
            pl.BlockSpec((1, N), lambda i, k: (0, 0)),
            pl.BlockSpec((1, N), lambda i, k: (0, 0)),
        ],
        out_specs=pl.BlockSpec((tm, N), lambda i, k: (i, 0)),
        out_shape=jax.ShapeDtypeStruct((M, N), jnp.bfloat16),
        scratch_shapes=[pltpu.VMEM((tm, N), jnp.float32)],
        compiler_params=_compiler_params(("parallel", "arbitrary")),
    )(x, w, b, residual, gamma, beta)


def _ffn_kernel(x_ref, w1_ref, b1_ref, w2_ref, b2_ref, g_ref, bb_ref,
                o_ref, acc_ref, *, eps):
    """Fused FFN: LN(x + (gelu(x @ w1 + b1)) @ w2 + b2), I-tiled grid axis.
    The (tm, ti) GELU intermediate lives only in VMEM/vregs."""
    @pl.when(pl.program_id(1) == 0)
    def _init():
        acc_ref[...] = jnp.zeros_like(acc_ref)

    h = jnp.dot(x_ref[...], w1_ref[...], preferred_element_type=jnp.float32)
    h = jax.nn.gelu(h + b1_ref[...], approximate=True)
    acc_ref[...] += jnp.dot(h.astype(jnp.bfloat16), w2_ref[...],
                            preferred_element_type=jnp.float32)

    @pl.when(pl.program_id(1) == pl.num_programs(1) - 1)
    def _finalize():
        y = acc_ref[...] + b2_ref[...] + x_ref[...].astype(jnp.float32)
        mu = jnp.mean(y, axis=-1, keepdims=True)
        var = jnp.mean((y - mu) * (y - mu), axis=-1, keepdims=True)
        inv = lax.rsqrt(var + eps)
        o_ref[...] = ((y - mu) * inv * g_ref[...] + bb_ref[...]).astype(o_ref.dtype)


def ffn_fused(x, w1, b1, w2, b2, gamma, beta, eps=1e-12, tm=512, ti=1024):
    """x:(M,H) bf16 (also the residual), w1:(H,I), w2:(I,H) bf16 -> (M,H) bf16."""
    M, H = x.shape
    I = w1.shape[1]
    tm = _pick_tile(M, tm, 16)
    ti = _pick_tile(I, ti, 128)
    grid = (M // tm, I // ti)
    return pl.pallas_call(
        functools.partial(_ffn_kernel, eps=eps),
        grid=grid,
        in_specs=[
            pl.BlockSpec((tm, H), lambda i, j: (i, 0)),   # x (and residual), const across j
            pl.BlockSpec((H, ti), lambda i, j: (0, j)),
            pl.BlockSpec((1, ti), lambda i, j: (0, j)),
            pl.BlockSpec((ti, H), lambda i, j: (j, 0)),
            pl.BlockSpec((1, H), lambda i, j: (0, 0)),
            pl.BlockSpec((1, H), lambda i, j: (0, 0)),
            pl.BlockSpec((1, H), lambda i, j: (0, 0)),
        ],
        out_specs=pl.BlockSpec((tm, H), lambda i, j: (i, 0)),
        out_shape=jax.ShapeDtypeStruct((M, H), jnp.bfloat16),
        scratch_shapes=[pltpu.VMEM((tm, H), jnp.float32)],
        compiler_params=_compiler_params(("parallel", "arbitrary")),
    )(x, w1, b1, w2, b2, gamma, beta)


def _layernorm_kernel(x_ref, g_ref, b_ref, o_ref, *, eps):
    x = x_ref[...].astype(jnp.float32)
    mu = jnp.mean(x, axis=-1, keepdims=True)
    var = jnp.mean((x - mu) * (x - mu), axis=-1, keepdims=True)
    inv = lax.rsqrt(var + eps)
    o_ref[...] = ((x - mu) * inv * g_ref[...] + b_ref[...]).astype(o_ref.dtype)


def layernorm(x, g, b, eps=1e-12, tm=512):
    """x:(M,H) f32 -> (M,H) bf16 (embedding LayerNorm)."""
    M, H = x.shape
    tm = _pick_tile(M, tm, 8)
    return pl.pallas_call(
        functools.partial(_layernorm_kernel, eps=eps),
        grid=(M // tm,),
        in_specs=[
            pl.BlockSpec((tm, H), lambda i: (i, 0)),
            pl.BlockSpec((1, H), lambda i: (0, 0)),
            pl.BlockSpec((1, H), lambda i: (0, 0)),
        ],
        out_specs=pl.BlockSpec((tm, H), lambda i: (i, 0)),
        out_shape=jax.ShapeDtypeStruct((M, H), jnp.bfloat16),
        compiler_params=_compiler_params(("parallel",)),
    )(x, g, b)


def _attn_kernel(q_ref, kv_ref, bias_ref, o_ref, *, num_heads, head_dim):
    """Query-tiled multi-head attention.  q_ref:(1,tq,3H), kv_ref:(1,S,3H) bf16,
    bias_ref:(1,1,S) f32 additive mask.  1/sqrt(Dh) already folded into Q.
    One head at a time: Ref slices bound live state; per-head stores to o_ref."""
    H = num_heads * head_dim
    bias = bias_ref[0]                                     # (1, S) f32
    for h in range(num_heads):
        lo = h * head_dim
        q = q_ref[0, :, lo:lo + head_dim]                  # (tq, Dh) bf16
        k = kv_ref[0, :, H + lo:H + lo + head_dim]         # (S, Dh) bf16
        v = kv_ref[0, :, 2 * H + lo:2 * H + lo + head_dim]  # (S, Dh) bf16
        # q @ k^T without an explicit transpose: contract last dims of both.
        s = lax.dot_general(q, k, (((1,), (1,)), ((), ())),
                            preferred_element_type=jnp.float32)   # (tq, S)
        s = s + bias
        s = s - jnp.max(s, axis=-1, keepdims=True)
        p = jnp.exp(s)
        p = p * pl.reciprocal(jnp.sum(p, axis=-1, keepdims=True), approx=True)
        ctx = jnp.dot(p.astype(jnp.bfloat16), v,
                      preferred_element_type=jnp.float32)         # (tq, Dh)
        o_ref[0, :, lo:lo + head_dim] = ctx.astype(o_ref.dtype)


def fused_attention(qkv, mask_bias, num_heads, head_dim, tq=256):
    """qkv:(B,S,3H) bf16, mask_bias:(B,1,S) f32 -> context (B,S,H) bf16."""
    B, S, H3 = qkv.shape
    H = num_heads * head_dim
    tq = _pick_tile(S, tq, 16)
    grid = (B, S // tq)
    return pl.pallas_call(
        functools.partial(_attn_kernel, num_heads=num_heads, head_dim=head_dim),
        grid=grid,
        in_specs=[
            pl.BlockSpec((1, tq, H3), lambda b, qi: (b, qi, 0)),  # Q rows (tiled)
            pl.BlockSpec((1, S, H3), lambda b, qi: (b, 0, 0)),    # KV slab, resident across qi
            pl.BlockSpec((1, 1, S), lambda b, qi: (b, 0, 0)),
        ],
        out_specs=pl.BlockSpec((1, tq, H), lambda b, qi: (b, qi, 0)),
        out_shape=jax.ShapeDtypeStruct((B, S, H), jnp.bfloat16),
        compiler_params=_compiler_params(("parallel", "arbitrary")),
    )(qkv, qkv, mask_bias)


# ------------------------------- model (glue) --------------------------------


def init_params(key, cfg):
    H, I, L, C = cfg["hidden"], cfg["intermediate"], cfg["layers"], cfg["class_num"]
    V, P = cfg["vocab_size"], cfg["max_pos"]
    nH = cfg["heads"]
    Dh = H // nH
    scale = 1.0 / (Dh ** 0.5)
    C_pad = 128                                   # lane-dense classifier output

    keys = iter(jax.random.split(key, 4 + 6 * L))

    def nrm(shape):
        return 0.02 * jax.random.normal(next(keys), shape, dtype=jnp.float32)

    wc = nrm((H, C))
    wc_pad = jnp.zeros((H, C_pad), jnp.float32).at[:, :C].set(wc)

    params = dict(
        word_emb=nrm((V, H)),
        pos_emb=nrm((P, H)),
        type_emb=nrm((2, H)),
        emb_ln_g=jnp.ones((1, H), jnp.float32),
        emb_ln_b=jnp.zeros((1, H), jnp.float32),
        wc_pad=wc_pad.astype(jnp.bfloat16),       # nn.Linear(bert_hidden, class_num)
        bc_pad=jnp.zeros((1, C_pad), jnp.float32),
        layers=[],
    )
    for _ in range(L):
        wq, wk, wv = nrm((H, H)), nrm((H, H)), nrm((H, H))
        # Fused QKV projection with 1/sqrt(Dh) folded into the Q columns.
        wqkv = jnp.concatenate([wq * scale, wk, wv], axis=1)
        bqkv = jnp.zeros((1, 3 * H), jnp.float32)   # Q-part would be scaled too (zeros here)
        params["layers"].append(dict(
            wqkv=wqkv.astype(jnp.bfloat16),
            bqkv=bqkv,
            wo=nrm((H, H)).astype(jnp.bfloat16), bo=jnp.zeros((1, H), jnp.float32),
            ln1_g=jnp.ones((1, H), jnp.float32), ln1_b=jnp.zeros((1, H), jnp.float32),
            w1=nrm((H, I)).astype(jnp.bfloat16), b1=jnp.zeros((1, I), jnp.float32),
            w2=nrm((I, H)).astype(jnp.bfloat16), b2=jnp.zeros((1, H), jnp.float32),
            ln2_g=jnp.ones((1, H), jnp.float32), ln2_b=jnp.zeros((1, H), jnp.float32),
        ))
    return params


def forward(params, input_ids, attention_mask, cfg):
    """labels=None, use_crf=False path: returns argmax(logits, -1), shape (B, S)."""
    B, S = input_ids.shape
    H, nH, C = cfg["hidden"], cfg["heads"], cfg["class_num"]
    Dh = H // nH

    # --- BERT embeddings (gather is glue) ---
    x = (params["word_emb"][input_ids]
         + params["pos_emb"][jnp.arange(S)][None, :, :]
         + params["type_emb"][0][None, None, :])
    x = x.reshape(B * S, H).astype(jnp.float32)
    x = layernorm(x, params["emb_ln_g"], params["emb_ln_b"])    # bf16 (B*S, H)

    # Additive mask bias computed once (not per head / per layer inside kernels).
    mask_bias = ((1.0 - attention_mask.astype(jnp.float32))
                 * jnp.float32(-10000.0)).reshape(B, 1, S)

    # --- BERT encoder layers ---
    for lyr in params["layers"]:
        qkv = dense(x, lyr["wqkv"], lyr["bqkv"])                 # (B*S, 3H) bf16
        ctx = fused_attention(qkv.reshape(B, S, 3 * H), mask_bias, nH, Dh)
        ctx = ctx.reshape(B * S, H)                              # free reshape
        # Output projection fused with residual-add + LayerNorm.
        x = dense_add_layernorm(ctx, lyr["wo"], lyr["bo"],
                                x, lyr["ln1_g"], lyr["ln1_b"])
        # Whole FFN (up + GELU + down + residual + LN) in one kernel; the
        # (B*S, I) intermediate never leaves VMEM.
        x = ffn_fused(x, lyr["w1"], lyr["b1"], lyr["w2"], lyr["b2"],
                      lyr["ln2_g"], lyr["ln2_b"])

    # Dropout(0.3) -> identity at inference.
    logits = dense(x, params["wc_pad"], params["bc_pad"],
                   out_dtype=jnp.float32)                        # (B*S, 128), lane-dense
    preds = jnp.argmax(logits[:, :C], axis=-1).reshape(B, S)     # tiny glue op
    return preds


# ---------------------------------- main --------------------------------------


if __name__ == "__main__":
    cfg = dict(
        vocab_size=100,
        hidden=32,          # bert_hidden_size (small synthetic)
        layers=2,
        heads=2,
        intermediate=64,
        max_pos=16,
        class_num=9,
        batch=2,
        seq=8,
    )

    root = jax.random.PRNGKey(0)
    k_params, k_ids = jax.random.split(root)

    params = init_params(k_params, cfg)

    input_ids = jax.random.randint(
        k_ids, (cfg["batch"], cfg["seq"]), 0, cfg["vocab_size"], dtype=jnp.int32)
    # Last two positions of each sequence are padding.
    attention_mask = jnp.ones((cfg["batch"], cfg["seq"]), jnp.int32).at[:, 6:].set(0)

    preds = forward(params, input_ids, attention_mask, cfg)
    jax.block_until_ready(preds)
    assert preds.shape == (cfg["batch"], cfg["seq"])
    assert bool(jnp.all((preds >= 0) & (preds < cfg["class_num"])))
    print("KERNEL_OK")
</pallas_src>

<mosaic_0001>
module attributes {stable_mosaic.version = 11 : i64} {
  func.func @_layernorm_kernel(%arg0: i32, %arg1: memref<16x32xf32, #tpu.memory_space<vmem>>, %arg2: memref<1x32xf32, #tpu.memory_space<vmem>>, %arg3: memref<1x32xf32, #tpu.memory_space<vmem>>, %arg4: memref<16x32xbf16, #tpu.memory_space<vmem>>) attributes {dimension_semantics = [#tpu.dimension_semantics<parallel>], iteration_bounds = array<i64: 1>, scalar_prefetch = 0 : i64, scratch_operands = 0 : i64, tpu.core_type = #tpu.core_type<tc>, window_params = [{transform_indices = @transform_0, window_bounds = array<i64: 16, 32>}, {pipeline_mode = #tpu.pipeline_mode<synchronous>, transform_indices = @transform_1, window_bounds = array<i64: 1, 32>}, {pipeline_mode = #tpu.pipeline_mode<synchronous>, transform_indices = @transform_2, window_bounds = array<i64: 1, 32>}, {transform_indices = @transform_3, window_bounds = array<i64: 16, 32>}]} {
    %c0 = arith.constant 0 : index
    %c0_0 = arith.constant 0 : index
    %0 = vector.load %arg1[%c0, %c0_0] : memref<16x32xf32, #tpu.memory_space<vmem>>, vector<16x32xf32>
    %cst = arith.constant dense<0.000000e+00> : vector<16xf32>
    %1 = vector.multi_reduction <add>, %0, %cst [1] : vector<16x32xf32> to vector<16xf32>
    %2 = vector.shape_cast %1 : vector<16xf32> to vector<16x1xf32>
    %cst_1 = arith.constant 3.200000e+01 : f32
    %3 = vector.broadcast %cst_1 : f32 to vector<16x1xf32>
    %4 = arith.divf %2, %3 : vector<16x1xf32>
    %5 = vector.broadcast %4 : vector<16x1xf32> to vector<16x32xf32>
    %6 = arith.subf %0, %5 : vector<16x32xf32>
    %7 = vector.broadcast %4 : vector<16x1xf32> to vector<16x32xf32>
    %8 = arith.subf %0, %7 : vector<16x32xf32>
    %9 = arith.mulf %6, %8 : vector<16x32xf32>
    %cst_2 = arith.constant dense<0.000000e+00> : vector<16xf32>
    %10 = vector.multi_reduction <add>, %9, %cst_2 [1] : vector<16x32xf32> to vector<16xf32>
    %11 = vector.shape_cast %10 : vector<16xf32> to vector<16x1xf32>
    %cst_3 = arith.constant 3.200000e+01 : f32
    %12 = vector.broadcast %cst_3 : f32 to vector<16x1xf32>
    %13 = arith.divf %11, %12 : vector<16x1xf32>
    %cst_4 = arith.constant 9.99999996E-13 : f32
    %14 = vector.broadcast %cst_4 : f32 to vector<16x1xf32>
    %15 = arith.addf %13, %14 : vector<16x1xf32>
    %16 = math.rsqrt %15 : vector<16x1xf32>
    %17 = vector.broadcast %4 : vector<16x1xf32> to vector<16x32xf32>
    %18 = arith.subf %0, %17 : vector<16x32xf32>
    %19 = vector.broadcast %16 : vector<16x1xf32> to vector<16x32xf32>
    %20 = arith.mulf %18, %19 : vector<16x32xf32>
    %c0_5 = arith.constant 0 : index
    %c0_6 = arith.constant 0 : index
    %21 = vector.load %arg2[%c0_5, %c0_6] : memref<1x32xf32, #tpu.memory_space<vmem>>, vector<1x32xf32>
    %22 = vector.broadcast %21 : vector<1x32xf32> to vector<16x32xf32>
    %23 = arith.mulf %20, %22 : vector<16x32xf32>
    %c0_7 = arith.constant 0 : index
    %c0_8 = arith.constant 0 : index
    %24 = vector.load %arg3[%c0_7, %c0_8] : memref<1x32xf32, #tpu.memory_space<vmem>>, vector<1x32xf32>
    %25 = vector.broadcast %24 : vector<1x32xf32> to vector<16x32xf32>
    %26 = arith.addf %23, %25 : vector<16x32xf32>
    %27 = arith.truncf %26 : vector<16x32xf32> to vector<16x32xbf16>
    %c0_9 = arith.constant 0 : index
    %c0_10 = arith.constant 0 : index
    %28 = vector.load %arg4[%c0_9, %c0_10] : memref<16x32xbf16, #tpu.memory_space<vmem>>, vector<16x32xbf16>
    tpu.vector_store %arg4[%c0_9, %c0_10], %27 {strides = array<i32>} : memref<16x32xbf16, #tpu.memory_space<vmem>>, vector<16x32xbf16>,
    return
  }
  func.func @transform_0(%arg0: i32) -> (i32, i32) {
    %c0_i32 = arith.constant 0 : i32
    %c0_i32_0 = arith.constant 0 : i32
    return %arg0, %c0_i32 : i32, i32
  }
  func.func @transform_1(%arg0: i32) -> (i32, i32) {
    %c0_i32 = arith.constant 0 : i32
    %c0_i32_0 = arith.constant 0 : i32
    %c0_i32_1 = arith.constant 0 : i32
    return %c0_i32, %c0_i32_0 : i32, i32
  }
  func.func @transform_2(%arg0: i32) -> (i32, i32) {
    %c0_i32 = arith.constant 0 : i32
    %c0_i32_0 = arith.constant 0 : i32
    %c0_i32_1 = arith.constant 0 : i32
    return %c0_i32, %c0_i32_0 : i32, i32
  }
  func.func @transform_3(%arg0: i32) -> (i32, i32) {
    %c0_i32 = arith.constant 0 : i32
    %c0_i32_0 = arith.constant 0 : i32
    return %arg0, %c0_i32 : i32, i32
  }
}

</mosaic_0001>

<bundles_post_ra>
// kernel: tpu_custom_call.1
= control target key start
LH: loop header
LB: loop body
LE: loop exit
PB: predicated region body
PF: predicated region fallthrough
CT: control target
= control target key end

     0   :  { %8 = vsyncpa [#allocation3], 0  ;;  %s274_s0 = inlined_call_operand.hbm [shape: f32[16,32], index: 0, kind: input, shape index: {}]   ;;  %s275_s1 = inlined_call_operand.hbm [shape: f32[1,32], index: 1, kind: input, shape index: {}]   ;;  %s276_s2 = inlined_call_operand.vmem [shape: f32[1,32], index: 2, kind: input, shape index: {}]   ;;  %s277_s3 = inlined_call_operand.hbm [shape: bf16[16,32], index: 3, kind: output, shape index: {}]  }
   0x1   :  { %9 = vsyncpa [#allocation6], 0 }
   0x2   :  { %10 = vsyncpa [#allocation4], 0  ;;  %s15_s14 = sshll.u32 %s274_s0, 4  ;;  %s230_s15 = smov [#allocation2]   ;;  %s16_s14 = int_to_ptr.hbm [resolvable:$true] %s15_s14 }
   0x3   :  { %s17_s16 = sshll.u32 %s230_s15, 4  ;;  %s29_s19 = sshll.u32 %s275_s1, 4  ;;  %s18_s16 = int_to_ptr.vmem [resolvable:$true] %s17_s16  ;;  %s30_s19 = int_to_ptr.hbm [resolvable:$true] %s29_s19 }
   0x4   :  { %s231_s20 = smov 128   ;;  %s232_s21 = smov 8  }
   0x5   :  { %23 = dma.hbm_to_vmem [thread:$0]  %s16_s14, 256, %s18_s16, [#allocation3], %s231_s20, %s231_s20, %s232_s21  }
   0x6   :  { %s233_s22 = smov [#allocation5]  }
   0x7   :  { %s31_s23 = sshll.u32 %s233_s22, 4  ;;  %s32_s23 = int_to_ptr.vmem [resolvable:$true] %s31_s23 }
   0x8   :  { %34 = dma.hbm_to_vmem [thread:$0]  %s30_s19, 16, %s32_s23, [#allocation6]  }
   0x9   :  { %224 = dma.done.wait [#allocation3], 256  }
   0xa   :  { %225 = vsyncadd [#allocation3], 4294967040 }
   0xb   :  { %226 = dma.done.wait [#allocation6], 16  }
   0xc   :  { %227 = vsyncadd [#allocation6], 4294967280  ;;  %vm47_vm0 = vcmask 261120   ;;  %v45_v0 = vld [vmem:[#allocation2] sm:$0xff]  ;;  %v46_v2 = vld [vmem:[#allocation2 + $0x8] sm:$0xff]  ;;  %v234_v4 = vmov 32.0  }
   0xd   :  { %v48_v1 = vsel %vm47_vm0, %v45_v0, 0.0  ;;  %v51_v3 = vsel %vm47_vm0, %v46_v2, 0.0  ;;  %146 = vrcp.f32 %v234_v4  ;;  %v144_v35 = vld [vmem:[#allocation5] ss:$0 sm:$0xff]  ;;  %v145_v38 = vld [vmem:[%s276_s2] ss:$0 sm:$0xff] }
   0xe   :  { %49 = vadd.xlane.f32.xlu0 %v48_v1  ;;  %vm113_vm7 = vcmask 257024   ;;  %s235_s24 = smov [#allocation7]   ;;  %s122_s2 = sshll.u32 %s277_s3, 4  ;;  %s123_s2 = int_to_ptr.hbm [resolvable:$true] %s122_s2 }
   0xf   :  { %s120_s25 = sshll.u32 %s235_s24, 4  ;;  %s236_s28 = smov 64   ;;  %s121_s25 = int_to_ptr.vmem [resolvable:$true] %s120_s25 }
  0x10   :  { %s237_s29 = smov 4  }
  0x13   :  { %v147_v5 = vpop.eup %146 }
  0x14   :  { %v55_v6 = vmul.f32 32.0, %v147_v5  ;;  %vm59_vm1 = vweird.f32 %v147_v5 }
  0x16   :  { %52 = vadd.xlane.f32.xlu0 %v51_v3  ;;  %v56_v7 = vsub.f32 1.0, %v55_v6 }
  0x18   :  { %v57_v8 = vmul.f32 %v147_v5, %v56_v7 }
  0x1a   :  { %v58_v9 = vadd.f32 %v147_v5, %v57_v8 }
  0x1c   :  { %v60_v10 = vsel %vm59_vm1, %v147_v5, %v58_v9 }
  0x81   :  { %v50_v11 = vpop.xlane.xlu0 %49 }
  0x82   :  { %v61_v12 = vmul.f32 %v60_v10, %v50_v11 }
  0x84   :  { %v63_v13 = vsub.f32 %v45_v0, %v61_v12 }
  0x86   :  { %v65_v14 = vmul.f32 %v63_v13, %v63_v13 }
  0x88   :  { %v67_v15 = vsel %vm47_vm0, %v65_v14, 0.0 }
  0x89   :  { %68 = vadd.xlane.f32.xlu1 %v67_v15  ;;  %v53_v16 = vpop.xlane.xlu0 %52 }
  0x8a   :  { %v62_v17 = vmul.f32 %v60_v10, %v53_v16 }
  0x8c   :  { %v64_v18 = vsub.f32 %v46_v2, %v62_v17 }
  0x8e   :  { %v66_v19 = vmul.f32 %v64_v18, %v64_v18 }
  0x90   :  { %v70_v20 = vsel %vm47_vm0, %v66_v19, 0.0 }
  0x91   :  { %71 = vadd.xlane.f32.xlu1 %v70_v20 }
  0xfc   :  { %v69_v21 = vpop.xlane.xlu1 %68 }
  0xfd   :  { %v73_v22 = vmul.f32 %v69_v21, %v60_v10 }
  0xff   :  { %v75_v23 = vadd.f32 1e-12, %v73_v22 }
 0x101   :  { %148 = vrsqrt.f32 %v75_v23  ;;  %vm83_vm3 = vweird.f32 %v75_v23 }
 0x104   :  { %v72_v24 = vpop.xlane.xlu1 %71 }
 0x105   :  { %v74_v25 = vmul.f32 %v72_v24, %v60_v10 }
 0x107   :  { %v149_v26 = vpop.eup %148  ;;  %v76_v27 = vadd.f32 1e-12, %v74_v25 }
 0x108   :  { %v78_v28 = vmul.f32 %v149_v26, %v75_v23  ;;  %vm84_vm2 = vweird.f32 %v149_v26 }
 0x109   :  { %150 = vrsqrt.f32 %v76_v27  ;;  %vm85_vm4 = vmor %vm83_vm3, %vm84_vm2  ;;  %vm93_vm6 = vweird.f32 %v76_v27 }
 0x10a   :  { %v79_v29 = vmul.f32 %v149_v26, %v78_v28 }
 0x10c   :  { %v80_v30 = vmul.f32 0.5, %v79_v29 }
 0x10e   :  { %v81_v31 = vsub.f32 1.5, %v80_v30 }
 0x10f   :  { %v151_v32 = vpop.eup %150 }
 0x110   :  { %v82_v33 = vmul.f32 %v149_v26, %v81_v31  ;;  %v88_v34 = vmul.f32 %v151_v32, %v76_v27  ;;  %vm94_vm5 = vweird.f32 %v151_v32 }
 0x111   :  { %vm95_vm8 = vmor %vm93_vm6, %vm94_vm5 }
 0x112   :  { %v86_v36 = vsel %vm85_vm4, %v149_v26, %v82_v33  ;;  %v89_v37 = vmul.f32 %v151_v32, %v88_v34 }
 0x113   :  { %v97_v39 = vmul.f32 %v86_v36, %v63_v13 }
 0x114   :  { %v90_v40 = vmul.f32 0.5, %v89_v37 }
 0x115   :  { %v103_v41 = vmul.f32 %v144_v35, %v97_v39 }
 0x116   :  { %v91_v42 = vsub.f32 1.5, %v90_v40 }
 0x117   :  { %v109_v43 = vadd.f32 %v145_v38, %v103_v41 }
 0x118   :  { %v92_v44 = vmul.f32 %v151_v32, %v91_v42 }
 0x119   :  { %v111_v45 = vpack.c.bf16 %v109_v43, %v109_v43 }
 0x11a   :  { %v96_v46 = vsel %vm95_vm8, %v151_v32, %v92_v44 }
 0x11b   :  { %v98_v47 = vmul.f32 %v96_v46, %v64_v18  ;;  %114 = vst.msk [vmem:[#allocation7] sm:$0xf] %vm113_vm7, %v111_v45 }
 0x11d   :  { %v104_v48 = vmul.f32 %v144_v35, %v98_v47 }
 0x11f   :  { %v110_v49 = vadd.f32 %v145_v38, %v104_v48 }
 0x121   :  { %v112_v50 = vpack.c.bf16 %v110_v49, %v110_v49 }
 0x123   :  { %115 = vst.msk [vmem:[#allocation7 + $0x4] sm:$0xf] %vm113_vm7, %v112_v50 }
 0x124   :  { %128 = dma.vmem_to_hbm [thread:$0]  %s121_s25, 128, %s123_s2, [#allocation4], %s236_s28, %s236_s28, %s237_s29  }
 0x125   :  { %228 = dma.done.wait [#allocation4], 128  }
 0x126   :  { %229 = vsyncadd [#allocation4], 4294967168 }
 0x127   :  { %133 = vsyncpa [#allocation3], 1 }
 0x128   :  { %134 = vsyncpa [#allocation6], 1 }
 0x129   :  { %135 = vsyncpa [#allocation4], 1 }

</bundles_post_ra>
